<compile_context>
chip_gen: v6e
topology: v6e:2x2x1
jax: 0.10.0
libtpu: 0.0.40
codegen_flags: <defaults>
</compile_context>

<pallas_src>
import jax
import jax.numpy as jnp
from jax.experimental import pallas as pl
from jax.experimental.pallas import tpu as pltpu

N_DIM = 3        # matches DDPM(n_dim=3) default
N_STEPS = 200    # matches DDPM(n_steps=200) default
HIDDEN = 64      # hidden width of ResidualMLPModel
BATCH = 8


def _cdiv(a, b):
    return (a + b - 1) // b


def _round_up(v, m):
    return ((v + m - 1) // m) * m


def ddpm_kernel(x_ref, t_ref, ttab_ref, winx_ref,
                w1a_ref, b1a_ref, w1b_ref, b1b_ref,
                w2a_ref, b2a_ref, w2b_ref, b2b_ref,
                wout_ref, bout_ref,
                out_ref):
    """One batch tile: in-kernel time-embed gather + input proj + 2 residual blocks + out proj."""
    f32 = jnp.float32
    bf16 = jnp.bfloat16

    def silu(v):
        # x * sigmoid(x); exp and the approximate reciprocal both go to the EUP,
        # keeping the divide off the VALU.  Kept in f32 (portable to v5e).
        return v * pl.reciprocal(1.0 + jnp.exp(-v), approx=True)

    tb = x_ref.shape[0]
    n_steps = ttab_ref.shape[0]

    # ---- time embedding: gather row t of the table via one_hot @ table (MXU) ----
    # The table already includes the input-projection bias and the temb half of
    # the concatenated input projection, so the result is the full temb+bias term.
    t = t_ref[...]                                                  # (tb, 1) int32
    iota = jax.lax.broadcasted_iota(jnp.int32, (tb, n_steps), 1)
    one_hot = (iota == t).astype(f32).astype(bf16)                  # exact 0/1
    h = jnp.dot(one_hot, ttab_ref[...], preferred_element_type=f32)  # (tb, H) f32

    # ---- input = cat([x, temb]); the x-half of the projection as VPU FMAs ----
    # (K = n_dim = 3: a degenerate MXU pass would be pure push/drain latency.)
    x = x_ref[...].astype(f32)                                      # (tb, n_dim)
    winx = winx_ref[...]                                            # (n_dim, H) f32
    for k in range(x.shape[1]):
        h = h + x[:, k:k + 1] * winx[k:k + 1, :]
    h = silu(h)

    # ---- residual block 1 (bf16 MXU operands, f32 accumulation/elementwise) ----
    r = silu(jnp.dot(h.astype(bf16), w1a_ref[...], preferred_element_type=f32)
             + b1a_ref[...])
    r = jnp.dot(r.astype(bf16), w1b_ref[...], preferred_element_type=f32) + b1b_ref[...]
    h = silu(h + r)

    # ---- residual block 2 ----
    r = silu(jnp.dot(h.astype(bf16), w2a_ref[...], preferred_element_type=f32)
             + b2a_ref[...])
    r = jnp.dot(r.astype(bf16), w2b_ref[...], preferred_element_type=f32) + b2b_ref[...]
    h = silu(h + r)

    # ---- output projection, unpadded (tb, n_dim) store ----
    out_ref[...] = (jnp.dot(h.astype(bf16), wout_ref[...], preferred_element_type=f32)
                    + bout_ref[...]).astype(out_ref.dtype)


def init_params(key, n_dim=N_DIM, hidden=HIDDEN):
    """Deterministic synthetic parameter init (scaled normals)."""
    def dense(k, fan_in, fan_out):
        kw, kb = jax.random.split(k)
        scale = 1.0 / jnp.sqrt(jnp.float32(fan_in))
        w = jax.random.normal(kw, (fan_in, fan_out), jnp.float32) * scale
        b = jax.random.normal(kb, (1, fan_out), jnp.float32) * 0.01
        return w, b

    ks = jax.random.split(key, 8)
    d = n_dim  # time_embed_dim == n_dim
    wt1, bt1 = dense(ks[0], 1, d)                 # TimeEmbedding lin1
    wt2, bt2 = dense(ks[1], d, d)                 # TimeEmbedding lin2
    win, bin_ = dense(ks[2], n_dim + d, hidden)   # input projection on cat([x, temb])
    winx, wint = win[:n_dim, :], win[n_dim:, :]   # split rows for the cat-free matmul
    w1a, b1a = dense(ks[3], hidden, hidden)
    w1b, b1b = dense(ks[4], hidden, hidden)
    w2a, b2a = dense(ks[5], hidden, hidden)
    w2b, b2b = dense(ks[6], hidden, hidden)
    wout, bout = dense(ks[7], hidden, n_dim)
    return (wt1, bt1, wt2, bt2, winx, wint, bin_,
            w1a, b1a, w1b, b1b, w2a, b2a, w2b, b2b, wout, bout)


def ddpm_forward(x, t, params, n_steps=N_STEPS, tile_b=2048):
    """x: [B, n_dim] float32, t: [B] int32  ->  predicted noise [B, n_dim] float32."""
    (wt1, bt1, wt2, bt2, winx, wint, bin_,
     w1a, b1a, w1b, b1b, w2a, b2a, w2b, b2b, wout, bout) = params

    b, n_dim = x.shape
    hidden = w1a.shape[0]
    bf16 = jnp.bfloat16

    # ---- precompute the time-embedding table (t has only n_steps distinct values):
    # table[s] = (SiLU((s/n)@wt1 + bt1)@wt2 + bt2)@wint + bin_   -> [n_steps, hidden]
    steps = (jnp.arange(n_steps, dtype=jnp.float32) / jnp.float32(n_steps)).reshape(n_steps, 1)
    temb = jax.nn.silu(steps @ wt1 + bt1) @ wt2 + bt2
    temb_table = (temb @ wint + bin_).astype(bf16)                 # bias folded in

    # ---- batch tiling: tile height always a multiple of 8; >=2 grid steps when
    # the batch allows so "parallel" can shard across v7x's two TensorCores.
    b_ceil = _round_up(b, 8)
    tile_b = max(8, _round_up(tile_b, 8))
    tb = min(tile_b, b_ceil)
    n_tiles = _cdiv(b_ceil, tb)
    if b_ceil >= 16 and n_tiles < 2:
        n_tiles = 2
    tb = _round_up(_cdiv(b_ceil, n_tiles), 8)
    n_tiles = _cdiv(b_ceil, tb)
    b_pad = n_tiles * tb

    x_in = x
    t_in = t.astype(jnp.int32)
    if b_pad != b:
        x_in = jnp.pad(x_in, ((0, b_pad - b), (0, 0)))
        t_in = jnp.pad(t_in, ((0, b_pad - b),))
    x_in = x_in.astype(bf16)
    t_in = t_in.reshape(b_pad, 1)

    def const_spec(shape):
        return pl.BlockSpec(shape, lambda i: (0, 0))

    in_specs = [
        pl.BlockSpec((tb, n_dim), lambda i: (i, 0)),              # x tile (bf16)
        pl.BlockSpec((tb, 1), lambda i: (i, 0)),                  # t tile (int32)
        const_spec((n_steps, hidden)),                            # temb table (bf16)
        const_spec((n_dim, hidden)),                              # winx (f32)
        const_spec((hidden, hidden)), const_spec((1, hidden)),    # w1a, b1a
        const_spec((hidden, hidden)), const_spec((1, hidden)),    # w1b, b1b
        const_spec((hidden, hidden)), const_spec((1, hidden)),    # w2a, b2a
        const_spec((hidden, hidden)), const_spec((1, hidden)),    # w2b, b2b
        const_spec((hidden, n_dim)), const_spec((1, n_dim)),      # wout, bout
    ]
    out_spec = pl.BlockSpec((tb, n_dim), lambda i: (i, 0))

    flops = 2 * b_pad * (n_steps * hidden + n_dim * hidden
                         + 4 * hidden * hidden + hidden * n_dim)
    transcendentals = 10 * b_pad * hidden                          # 5 SiLUs: exp + recip
    weight_bytes = (2 * (n_steps * hidden + 4 * hidden * hidden + hidden * n_dim)
                    + 4 * (n_dim * hidden + 4 * hidden + n_dim))
    bytes_accessed = b_pad * (2 * n_dim + 4 + 4 * n_dim) + weight_bytes

    out = pl.pallas_call(
        ddpm_kernel,
        out_shape=jax.ShapeDtypeStruct((b_pad, n_dim), jnp.float32),
        grid=(n_tiles,),
        in_specs=in_specs,
        out_specs=out_spec,
        compiler_params=pltpu.CompilerParams(
            dimension_semantics=("parallel",),
            vmem_limit_bytes=32 * 1024 * 1024),
        cost_estimate=pl.CostEstimate(
            flops=flops,
            transcendentals=transcendentals,
            bytes_accessed=bytes_accessed),
    )(x_in, t_in,
      temb_table, winx,
      w1a.astype(bf16), b1a, w1b.astype(bf16), b1b,
      w2a.astype(bf16), b2a, w2b.astype(bf16), b2b,
      wout.astype(bf16), bout)

    return out[:b] if b_pad != b else out


def ddpm_forward_ref(x, t, params, n_steps=N_STEPS):
    """Pure-JAX f32 reference (cat + single matmul form) for correctness check."""
    (wt1, bt1, wt2, bt2, winx, wint, bin_,
     w1a, b1a, w1b, b1b, w2a, b2a, w2b, b2b, wout, bout) = params
    silu = jax.nn.silu
    tn = (t.astype(jnp.float32) / n_steps).reshape(-1, 1)
    temb = silu(tn @ wt1 + bt1) @ wt2 + bt2
    inp = jnp.concatenate([x, temb], axis=-1)
    h = silu(inp @ jnp.concatenate([winx, wint], axis=0) + bin_)
    r = silu(h @ w1a + b1a) @ w1b + b1b
    h = silu(h + r)
    r = silu(h @ w2a + b2a) @ w2b + b2b
    h = silu(h + r)
    return h @ wout + bout


if __name__ == "__main__":
    key = jax.random.PRNGKey(0)
    k_x, k_t, k_p = jax.random.split(key, 3)

    x = jax.random.normal(k_x, (BATCH, N_DIM), jnp.float32)
    t = jax.random.randint(k_t, (BATCH,), 0, N_STEPS, dtype=jnp.int32)
    params = init_params(k_p)

    noise = jax.block_until_ready(ddpm_forward(x, t, params))
    ref = ddpm_forward_ref(x, t, params)

    assert noise.shape == (BATCH, N_DIM)
    # bf16 matmul operands + approx-reciprocal SiLU vs. an f32 reference.
    assert jnp.allclose(noise, ref, atol=5e-2, rtol=5e-2), \
        float(jnp.max(jnp.abs(noise - ref)))

    print("KERNEL_OK")
</pallas_src>

<mosaic_0001>
module attributes {stable_mosaic.version = 11 : i64} {
  func.func @ddpm_kernel(%arg0: i32, %arg1: memref<8x3xbf16, #tpu.memory_space<vmem>>, %arg2: memref<8x1xi32, #tpu.memory_space<vmem>>, %arg3: memref<200x64xbf16, #tpu.memory_space<vmem>>, %arg4: memref<3x64xf32, #tpu.memory_space<vmem>>, %arg5: memref<64x64xbf16, #tpu.memory_space<vmem>>, %arg6: memref<1x64xf32, #tpu.memory_space<vmem>>, %arg7: memref<64x64xbf16, #tpu.memory_space<vmem>>, %arg8: memref<1x64xf32, #tpu.memory_space<vmem>>, %arg9: memref<64x64xbf16, #tpu.memory_space<vmem>>, %arg10: memref<1x64xf32, #tpu.memory_space<vmem>>, %arg11: memref<64x64xbf16, #tpu.memory_space<vmem>>, %arg12: memref<1x64xf32, #tpu.memory_space<vmem>>, %arg13: memref<64x3xbf16, #tpu.memory_space<vmem>>, %arg14: memref<1x3xf32, #tpu.memory_space<vmem>>, %arg15: memref<8x3xf32, #tpu.memory_space<vmem>>) attributes {dimension_semantics = [#tpu.dimension_semantics<parallel>], iteration_bounds = array<i64: 1>, scalar_prefetch = 0 : i64, scratch_operands = 0 : i64, tpu.core_type = #tpu.core_type<tc>, window_params = [{transform_indices = @transform_0, window_bounds = array<i64: 8, 3>}, {transform_indices = @transform_1, window_bounds = array<i64: 8, 1>}, {pipeline_mode = #tpu.pipeline_mode<synchronous>, transform_indices = @transform_2, window_bounds = array<i64: 200, 64>}, {pipeline_mode = #tpu.pipeline_mode<synchronous>, transform_indices = @transform_3, window_bounds = array<i64: 3, 64>}, {pipeline_mode = #tpu.pipeline_mode<synchronous>, transform_indices = @transform_4, window_bounds = array<i64: 64, 64>}, {pipeline_mode = #tpu.pipeline_mode<synchronous>, transform_indices = @transform_5, window_bounds = array<i64: 1, 64>}, {pipeline_mode = #tpu.pipeline_mode<synchronous>, transform_indices = @transform_6, window_bounds = array<i64: 64, 64>}, {pipeline_mode = #tpu.pipeline_mode<synchronous>, transform_indices = @transform_7, window_bounds = array<i64: 1, 64>}, {pipeline_mode = #tpu.pipeline_mode<synchronous>, transform_indices = @transform_8, window_bounds = array<i64: 64, 64>}, {pipeline_mode = #tpu.pipeline_mode<synchronous>, transform_indices = @transform_9, window_bounds = array<i64: 1, 64>}, {pipeline_mode = #tpu.pipeline_mode<synchronous>, transform_indices = @transform_10, window_bounds = array<i64: 64, 64>}, {pipeline_mode = #tpu.pipeline_mode<synchronous>, transform_indices = @transform_11, window_bounds = array<i64: 1, 64>}, {pipeline_mode = #tpu.pipeline_mode<synchronous>, transform_indices = @transform_12, window_bounds = array<i64: 64, 3>}, {pipeline_mode = #tpu.pipeline_mode<synchronous>, transform_indices = @transform_13, window_bounds = array<i64: 1, 3>}, {transform_indices = @transform_14, window_bounds = array<i64: 8, 3>}]} {
    %c0 = arith.constant 0 : index
    %c0_0 = arith.constant 0 : index
    %0 = vector.load %arg2[%c0, %c0_0] : memref<8x1xi32, #tpu.memory_space<vmem>>, vector<8x1xi32>
    %1 = tpu.iota {dimensions = array<i32: 1>} : vector<8x200xi32>
    %2 = vector.broadcast %0 : vector<8x1xi32> to vector<8x200xi32>
    %3 = arith.cmpi eq, %1, %2 : vector<8x200xi32>
    %4 = arith.extui %3 : vector<8x200xi1> to vector<8x200xi32>
    %5 = arith.sitofp %4 : vector<8x200xi32> to vector<8x200xf32>
    %6 = arith.truncf %5 : vector<8x200xf32> to vector<8x200xbf16>
    %c0_1 = arith.constant 0 : index
    %c0_2 = arith.constant 0 : index
    %7 = vector.load %arg3[%c0_1, %c0_2] : memref<200x64xbf16, #tpu.memory_space<vmem>>, vector<200x64xbf16>
    %cst = arith.constant dense<0.000000e+00> : vector<8x64xf32>
    %8 = tpu.matmul %6, %7, %cst {dimension_numbers = #tpu.dot_dimension_numbers<[1], [0], [0], [1], [0, 0, 1, 1], [], []>} : vector<8x200xbf16>, vector<200x64xbf16>, vector<8x64xf32> -> vector<8x64xf32>
    %c0_3 = arith.constant 0 : index
    %c0_4 = arith.constant 0 : index
    %9 = vector.load %arg1[%c0_3, %c0_4] : memref<8x3xbf16, #tpu.memory_space<vmem>>, vector<8x3xbf16>
    %10 = arith.extf %9 : vector<8x3xbf16> to vector<8x3xf32>
    %c0_5 = arith.constant 0 : index
    %c0_6 = arith.constant 0 : index
    %11 = vector.load %arg4[%c0_5, %c0_6] : memref<3x64xf32, #tpu.memory_space<vmem>>, vector<3x64xf32>
    %12 = vector.extract_strided_slice %10 {offsets = [0, 0], sizes = [8, 1], strides = [1, 1]} : vector<8x3xf32> to vector<8x1xf32>
    %13 = vector.extract_strided_slice %11 {offsets = [0, 0], sizes = [1, 64], strides = [1, 1]} : vector<3x64xf32> to vector<1x64xf32>
    %14 = vector.broadcast %12 : vector<8x1xf32> to vector<8x64xf32>
    %15 = vector.broadcast %13 : vector<1x64xf32> to vector<8x64xf32>
    %16 = arith.mulf %14, %15 : vector<8x64xf32>
    %17 = arith.addf %8, %16 : vector<8x64xf32>
    %18 = vector.extract_strided_slice %10 {offsets = [0, 1], sizes = [8, 1], strides = [1, 1]} : vector<8x3xf32> to vector<8x1xf32>
    %19 = vector.extract_strided_slice %11 {offsets = [1, 0], sizes = [1, 64], strides = [1, 1]} : vector<3x64xf32> to vector<1x64xf32>
    %20 = vector.broadcast %18 : vector<8x1xf32> to vector<8x64xf32>
    %21 = vector.broadcast %19 : vector<1x64xf32> to vector<8x64xf32>
    %22 = arith.mulf %20, %21 : vector<8x64xf32>
    %23 = arith.addf %17, %22 : vector<8x64xf32>
    %24 = vector.extract_strided_slice %10 {offsets = [0, 2], sizes = [8, 1], strides = [1, 1]} : vector<8x3xf32> to vector<8x1xf32>
    %25 = vector.extract_strided_slice %11 {offsets = [2, 0], sizes = [1, 64], strides = [1, 1]} : vector<3x64xf32> to vector<1x64xf32>
    %26 = vector.broadcast %24 : vector<8x1xf32> to vector<8x64xf32>
    %27 = vector.broadcast %25 : vector<1x64xf32> to vector<8x64xf32>
    %28 = arith.mulf %26, %27 : vector<8x64xf32>
    %29 = arith.addf %23, %28 : vector<8x64xf32>
    %cst_7 = arith.constant 0.000000e+00 : f32
    %30 = vector.broadcast %cst_7 : f32 to vector<8x64xf32>
    %31 = arith.subf %30, %29 : vector<8x64xf32>
    %32 = math.exp %31 : vector<8x64xf32>
    %cst_8 = arith.constant 1.000000e+00 : f32
    %33 = vector.broadcast %cst_8 : f32 to vector<8x64xf32>
    %34 = arith.addf %33, %32 : vector<8x64xf32>
    %35 = tpu.reciprocal %34 {approx = true} : vector<8x64xf32> -> vector<8x64xf32>
    %36 = arith.mulf %29, %35 : vector<8x64xf32>
    %37 = arith.truncf %36 : vector<8x64xf32> to vector<8x64xbf16>
    %c0_9 = arith.constant 0 : index
    %c0_10 = arith.constant 0 : index
    %38 = vector.load %arg5[%c0_9, %c0_10] : memref<64x64xbf16, #tpu.memory_space<vmem>>, vector<64x64xbf16>
    %cst_11 = arith.constant dense<0.000000e+00> : vector<8x64xf32>
    %39 = tpu.matmul %37, %38, %cst_11 {dimension_numbers = #tpu.dot_dimension_numbers<[1], [0], [0], [1], [0, 0, 1, 1], [], []>} : vector<8x64xbf16>, vector<64x64xbf16>, vector<8x64xf32> -> vector<8x64xf32>
    %c0_12 = arith.constant 0 : index
    %c0_13 = arith.constant 0 : index
    %40 = vector.load %arg6[%c0_12, %c0_13] : memref<1x64xf32, #tpu.memory_space<vmem>>, vector<1x64xf32>
    %41 = vector.broadcast %40 : vector<1x64xf32> to vector<8x64xf32>
    %42 = arith.addf %39, %41 : vector<8x64xf32>
    %cst_14 = arith.constant 0.000000e+00 : f32
    %43 = vector.broadcast %cst_14 : f32 to vector<8x64xf32>
    %44 = arith.subf %43, %42 : vector<8x64xf32>
    %45 = math.exp %44 : vector<8x64xf32>
    %cst_15 = arith.constant 1.000000e+00 : f32
    %46 = vector.broadcast %cst_15 : f32 to vector<8x64xf32>
    %47 = arith.addf %46, %45 : vector<8x64xf32>
    %48 = tpu.reciprocal %47 {approx = true} : vector<8x64xf32> -> vector<8x64xf32>
    %49 = arith.mulf %42, %48 : vector<8x64xf32>
    %50 = arith.truncf %49 : vector<8x64xf32> to vector<8x64xbf16>
    %c0_16 = arith.constant 0 : index
    %c0_17 = arith.constant 0 : index
    %51 = vector.load %arg7[%c0_16, %c0_17] : memref<64x64xbf16, #tpu.memory_space<vmem>>, vector<64x64xbf16>
    %cst_18 = arith.constant dense<0.000000e+00> : vector<8x64xf32>
    %52 = tpu.matmul %50, %51, %cst_18 {dimension_numbers = #tpu.dot_dimension_numbers<[1], [0], [0], [1], [0, 0, 1, 1], [], []>} : vector<8x64xbf16>, vector<64x64xbf16>, vector<8x64xf32> -> vector<8x64xf32>
    %c0_19 = arith.constant 0 : index
    %c0_20 = arith.constant 0 : index
    %53 = vector.load %arg8[%c0_19, %c0_20] : memref<1x64xf32, #tpu.memory_space<vmem>>, vector<1x64xf32>
    %54 = vector.broadcast %53 : vector<1x64xf32> to vector<8x64xf32>
    %55 = arith.addf %52, %54 : vector<8x64xf32>
    %56 = arith.addf %36, %55 : vector<8x64xf32>
    %cst_21 = arith.constant 0.000000e+00 : f32
    %57 = vector.broadcast %cst_21 : f32 to vector<8x64xf32>
    %58 = arith.subf %57, %56 : vector<8x64xf32>
    %59 = math.exp %58 : vector<8x64xf32>
    %cst_22 = arith.constant 1.000000e+00 : f32
    %60 = vector.broadcast %cst_22 : f32 to vector<8x64xf32>
    %61 = arith.addf %60, %59 : vector<8x64xf32>
    %62 = tpu.reciprocal %61 {approx = true} : vector<8x64xf32> -> vector<8x64xf32>
    %63 = arith.mulf %56, %62 : vector<8x64xf32>
    %64 = arith.truncf %63 : vector<8x64xf32> to vector<8x64xbf16>
    %c0_23 = arith.constant 0 : index
    %c0_24 = arith.constant 0 : index
    %65 = vector.load %arg9[%c0_23, %c0_24] : memref<64x64xbf16, #tpu.memory_space<vmem>>, vector<64x64xbf16>
    %cst_25 = arith.constant dense<0.000000e+00> : vector<8x64xf32>
    %66 = tpu.matmul %64, %65, %cst_25 {dimension_numbers = #tpu.dot_dimension_numbers<[1], [0], [0], [1], [0, 0, 1, 1], [], []>} : vector<8x64xbf16>, vector<64x64xbf16>, vector<8x64xf32> -> vector<8x64xf32>
    %c0_26 = arith.constant 0 : index
    %c0_27 = arith.constant 0 : index
    %67 = vector.load %arg10[%c0_26, %c0_27] : memref<1x64xf32, #tpu.memory_space<vmem>>, vector<1x64xf32>
    %68 = vector.broadcast %67 : vector<1x64xf32> to vector<8x64xf32>
    %69 = arith.addf %66, %68 : vector<8x64xf32>
    %cst_28 = arith.constant 0.000000e+00 : f32
    %70 = vector.broadcast %cst_28 : f32 to vector<8x64xf32>
    %71 = arith.subf %70, %69 : vector<8x64xf32>
    %72 = math.exp %71 : vector<8x64xf32>
    %cst_29 = arith.constant 1.000000e+00 : f32
    %73 = vector.broadcast %cst_29 : f32 to vector<8x64xf32>
    %74 = arith.addf %73, %72 : vector<8x64xf32>
    %75 = tpu.reciprocal %74 {approx = true} : vector<8x64xf32> -> vector<8x64xf32>
    %76 = arith.mulf %69, %75 : vector<8x64xf32>
    %77 = arith.truncf %76 : vector<8x64xf32> to vector<8x64xbf16>
    %c0_30 = arith.constant 0 : index
    %c0_31 = arith.constant 0 : index
    %78 = vector.load %arg11[%c0_30, %c0_31] : memref<64x64xbf16, #tpu.memory_space<vmem>>, vector<64x64xbf16>
    %cst_32 = arith.constant dense<0.000000e+00> : vector<8x64xf32>
    %79 = tpu.matmul %77, %78, %cst_32 {dimension_numbers = #tpu.dot_dimension_numbers<[1], [0], [0], [1], [0, 0, 1, 1], [], []>} : vector<8x64xbf16>, vector<64x64xbf16>, vector<8x64xf32> -> vector<8x64xf32>
    %c0_33 = arith.constant 0 : index
    %c0_34 = arith.constant 0 : index
    %80 = vector.load %arg12[%c0_33, %c0_34] : memref<1x64xf32, #tpu.memory_space<vmem>>, vector<1x64xf32>
    %81 = vector.broadcast %80 : vector<1x64xf32> to vector<8x64xf32>
    %82 = arith.addf %79, %81 : vector<8x64xf32>
    %83 = arith.addf %63, %82 : vector<8x64xf32>
    %cst_35 = arith.constant 0.000000e+00 : f32
    %84 = vector.broadcast %cst_35 : f32 to vector<8x64xf32>
    %85 = arith.subf %84, %83 : vector<8x64xf32>
    %86 = math.exp %85 : vector<8x64xf32>
    %cst_36 = arith.constant 1.000000e+00 : f32
    %87 = vector.broadcast %cst_36 : f32 to vector<8x64xf32>
    %88 = arith.addf %87, %86 : vector<8x64xf32>
    %89 = tpu.reciprocal %88 {approx = true} : vector<8x64xf32> -> vector<8x64xf32>
    %90 = arith.mulf %83, %89 : vector<8x64xf32>
    %91 = arith.truncf %90 : vector<8x64xf32> to vector<8x64xbf16>
    %c0_37 = arith.constant 0 : index
    %c0_38 = arith.constant 0 : index
    %92 = vector.load %arg13[%c0_37, %c0_38] : memref<64x3xbf16, #tpu.memory_space<vmem>>, vector<64x3xbf16>
    %cst_39 = arith.constant dense<0.000000e+00> : vector<8x3xf32>
    %93 = tpu.matmul %91, %92, %cst_39 {dimension_numbers = #tpu.dot_dimension_numbers<[1], [0], [0], [1], [0, 0, 1, 1], [], []>} : vector<8x64xbf16>, vector<64x3xbf16>, vector<8x3xf32> -> vector<8x3xf32>
    %c0_40 = arith.constant 0 : index
    %c0_41 = arith.constant 0 : index
    %94 = vector.load %arg14[%c0_40, %c0_41] : memref<1x3xf32, #tpu.memory_space<vmem>>, vector<1x3xf32>
    %95 = vector.broadcast %94 : vector<1x3xf32> to vector<8x3xf32>
    %96 = arith.addf %93, %95 : vector<8x3xf32>
    %c0_42 = arith.constant 0 : index
    %c0_43 = arith.constant 0 : index
    %97 = vector.load %arg15[%c0_42, %c0_43] : memref<8x3xf32, #tpu.memory_space<vmem>>, vector<8x3xf32>
    tpu.vector_store %arg15[%c0_42, %c0_43], %96 {strides = array<i32>} : memref<8x3xf32, #tpu.memory_space<vmem>>, vector<8x3xf32>,
    return
  }
  func.func @transform_0(%arg0: i32) -> (i32, i32) {
    %c0_i32 = arith.constant 0 : i32
    %c0_i32_0 = arith.constant 0 : i32
    return %arg0, %c0_i32 : i32, i32
  }
  func.func @transform_1(%arg0: i32) -> (i32, i32) {
    %c0_i32 = arith.constant 0 : i32
    %c0_i32_0 = arith.constant 0 : i32
    return %arg0, %c0_i32 : i32, i32
  }
  func.func @transform_2(%arg0: i32) -> (i32, i32) {
    %c0_i32 = arith.constant 0 : i32
    %c0_i32_0 = arith.constant 0 : i32
    %c0_i32_1 = arith.constant 0 : i32
    return %c0_i32, %c0_i32_0 : i32, i32
  }
  func.func @transform_3(%arg0: i32) -> (i32, i32) {
    %c0_i32 = arith.constant 0 : i32
    %c0_i32_0 = arith.constant 0 : i32
    %c0_i32_1 = arith.constant 0 : i32
    return %c0_i32, %c0_i32_0 : i32, i32
  }
  func.func @transform_4(%arg0: i32) -> (i32, i32) {
    %c0_i32 = arith.constant 0 : i32
    %c0_i32_0 = arith.constant 0 : i32
    %c0_i32_1 = arith.constant 0 : i32
    return %c0_i32, %c0_i32_0 : i32, i32
  }
  func.func @transform_5(%arg0: i32) -> (i32, i32) {
    %c0_i32 = arith.constant 0 : i32
    %c0_i32_0 = arith.constant 0 : i32
    %c0_i32_1 = arith.constant 0 : i32
    return %c0_i32, %c0_i32_0 : i32, i32
  }
  func.func @transform_6(%arg0: i32) -> (i32, i32) {
    %c0_i32 = arith.constant 0 : i32
    %c0_i32_0 = arith.constant 0 : i32
    %c0_i32_1 = arith.constant 0 : i32
    return %c0_i32, %c0_i32_0 : i32, i32
  }
  func.func @transform_7(%arg0: i32) -> (i32, i32) {
    %c0_i32 = arith.constant 0 : i32
    %c0_i32_0 = arith.constant 0 : i32
    %c0_i32_1 = arith.constant 0 : i32
    return %c0_i32, %c0_i32_0 : i32, i32
  }
  func.func @transform_8(%arg0: i32) -> (i32, i32) {
    %c0_i32 = arith.constant 0 : i32
    %c0_i32_0 = arith.constant 0 : i32
    %c0_i32_1 = arith.constant 0 : i32
    return %c0_i32, %c0_i32_0 : i32, i32
  }
  func.func @transform_9(%arg0: i32) -> (i32, i32) {
    %c0_i32 = arith.constant 0 : i32
    %c0_i32_0 = arith.constant 0 : i32
    %c0_i32_1 = arith.constant 0 : i32
    return %c0_i32, %c0_i32_0 : i32, i32
  }
  func.func @transform_10(%arg0: i32) -> (i32, i32) {
    %c0_i32 = arith.constant 0 : i32
    %c0_i32_0 = arith.constant 0 : i32
    %c0_i32_1 = arith.constant 0 : i32
    return %c0_i32, %c0_i32_0 : i32, i32
  }
  func.func @transform_11(%arg0: i32) -> (i32, i32) {
    %c0_i32 = arith.constant 0 : i32
    %c0_i32_0 = arith.constant 0 : i32
    %c0_i32_1 = arith.constant 0 : i32
    return %c0_i32, %c0_i32_0 : i32, i32
  }
  func.func @transform_12(%arg0: i32) -> (i32, i32) {
    %c0_i32 = arith.constant 0 : i32
    %c0_i32_0 = arith.constant 0 : i32
    %c0_i32_1 = arith.constant 0 : i32
    return %c0_i32, %c0_i32_0 : i32, i32
  }
  func.func @transform_13(%arg0: i32) -> (i32, i32) {
    %c0_i32 = arith.constant 0 : i32
    %c0_i32_0 = arith.constant 0 : i32
    %c0_i32_1 = arith.constant 0 : i32
    return %c0_i32, %c0_i32_0 : i32, i32
  }
  func.func @transform_14(%arg0: i32) -> (i32, i32) {
    %c0_i32 = arith.constant 0 : i32
    %c0_i32_0 = arith.constant 0 : i32
    return %arg0, %c0_i32 : i32, i32
  }
}

</mosaic_0001>

<bundles_post_ra>
// kernel: tpu_custom_call.1
= control target key start
LH: loop header
LB: loop body
LE: loop exit
PB: predicated region body
PF: predicated region fallthrough
CT: control target
= control target key end

     0   :  { %v894_v0 = vmov 0   ;;  %v895_v5 = vmov 0.0   ;;  %v896_v7 = vmov 1   ;;  %v897_v9 = vmov 2   ;;  %s1137_s1 = inlined_call_operand.vmem [shape: s32[8,1], index: 1, kind: input, shape index: {}]   ;;  %s1138_s0 = inlined_call_operand.vmem [shape: bf16[8,3], index: 0, kind: input, shape index: {}]   ;;  %s1139_s2 = inlined_call_operand.vmem [shape: bf16[200,64], index: 2, kind: input, shape index: {}]   ;;  %s1140_s4 = inlined_call_operand.vmem [shape: bf16[64,64], index: 4, kind: input, shape index: {}]   ;;  %s1141_s3 = inlined_call_operand.vmem [shape: f32[3,64], index: 3, kind: input, shape index: {}]   ;;  %s1142_s6 = inlined_call_operand.vmem [shape: bf16[64,64], index: 6, kind: input, shape index: {}]   ;;  %s1143_s5 = inlined_call_operand.vmem [shape: f32[1,64], index: 5, kind: input, shape index: {}]   ;;  %s1144_s8 = inlined_call_operand.vmem [shape: bf16[64,64], index: 8, kind: input, shape index: {}]   ;;  %s1145_s7 = inlined_call_operand.vmem [shape: f32[1,64], index: 7, kind: input, shape index: {}]   ;;  %s1146_s10 = inlined_call_operand.vmem [shape: bf16[64,64], index: 10, kind: input, shape index: {}]   ;;  %s1147_s9 = inlined_call_operand.vmem [shape: f32[1,64], index: 9, kind: input, shape index: {}]   ;;  %s1148_s12 = inlined_call_operand.vmem [shape: bf16[64,3], index: 12, kind: input, shape index: {}]   ;;  %s1149_s11 = inlined_call_operand.vmem [shape: f32[1,64], index: 11, kind: input, shape index: {}]   ;;  %s1150_s13 = inlined_call_operand.vmem [shape: f32[1,3], index: 13, kind: input, shape index: {}]   ;;  %s1151_s14 = inlined_call_operand.vmem [shape: f32[8,3], index: 14, kind: output, shape index: {}]  }
   0x1   :  { %837 = vset.pattern.permute.xlu0 %v894_v0  ;;  %v48_v1 = vld [vmem:[%s1137_s1] sm:$0xff]  ;;  %184 = vmatprep.subr.bf16.mxu0 %v894_v0  ;;  %v841_v4 = vld [vmem:[%s1139_s2 + $0x38] sm:$0xff]   ;;  %v842_v6 = vld [vmem:[%s1139_s2 + $0x30] sm:$0xff]   ;;  %vm180_vm0 = vcmask 1043456   ;;  %v49_v21 = vlaneseq  ;;  %vm176_vm3 = vcmask 588800   ;;  %vm899_vm5 = vmmov 0  }
   0x2   :  { %v88_v2 = vld [vmem:[%s1138_s0] sm:$0xf]  ;;  %53 = vperm.xlu0 %837, %v48_v1   ;;  %771 = vmatprep.subr.bf16.mxu1 %v895_v5  ;;  %v843_v8 = vld [vmem:[%s1139_s2 + $0x28] sm:$0xff]   ;;  %v845_v11 = vld [vmem:[%s1139_s2 + $0x18] sm:$0xff]   ;;  %v898_v27 = vmov 1.0|1.0  }
   0x3   :  { %v89_v3 = vunpack.c.l.bf16 %v88_v2  ;;  %185 = vmatpush1.bf16.msra.mxu0 %v841_v4  ;;  %838 = vset.pattern.permute.xlu1 %v896_v7  ;;  %v844_v10 = vld [vmem:[%s1139_s2 + $0x20] sm:$0xff]   ;;  %v846_v12 = vld [vmem:[%s1139_s2 + $0x10] sm:$0xff]   ;;  %v847_v13 = vld [vmem:[%s1139_s2 + $0x8] sm:$0xff]   ;;  %v50_v22 = vand.u32 127, %v49_v21  ;;  %v97_v32 = vshrl.u32 %v49_v21, 7  ;;  %vm290_vm6 = vcmask 523264  }
   0x4   :  { %186 = vmatprep.subr.bf16.mxu0 %v894_v0  ;;  %v848_v14 = vld [vmem:[%s1139_s2] sm:$0xff]   ;;  %v850_v17 = vld [vmem:[%s1139_s2 + $0x58] sm:$0xff]   ;;  %v851_v18 = vld [vmem:[%s1139_s2 + $0x50] sm:$0xff]   ;;  %779 = vmatprep.mubr.msk.bf16.mxu1 %vm899_vm5, %v895_v5  ;;  %vm692_vm7 = vcmask 23552  }
   0x5   :  { %225 = vperm.xlu1 %838, %v89_v3   ;;  %v849_v15 = vld [vmem:[%s1139_s2 + $0x60] ss:$0 sps:$4 sm:$0xff]   ;;  %v852_v19 = vld [vmem:[%s1139_s2 + $0x48] sm:$0xff]   ;;  %v51_v23 = vadd.s32 128, %v50_v22  ;;  %v854_v28 = vld [vmem:[%s1140_s4 + $0x18] sm:$0xff]   ;;  %v98_v33 = vsub.s32 0, %v97_v32 }
   0x6   :  { %93 = vperm.xlu0 %837, %v89_v3   ;;  %v182_v16 = vsel %vm180_vm0, %v849_v15, 0  ;;  %v853_v20 = vld [vmem:[%s1139_s2 + $0x40] sm:$0xff]   ;;  %772 = vmatpush3.bf16.msra.mxu1 %v854_v28  ;;  %v855_v29 = vld [vmem:[%s1140_s4 + $0x10] sm:$0xff]   ;;  %v856_v30 = vld [vmem:[%s1140_s4 + $0x8] sm:$0xff]   ;;  %v230_v36 = vsub.s32 1, %v97_v32  ;;  %v240_v37 = vsub.s32 2, %v97_v32 }
   0x7   :  { %187 = vmatpush1.bf16.msra.mxu0 %v842_v6  ;;  %773 = vmatprep.subr.bf16.mxu1 %v895_v5  ;;  %v857_v31 = vld [vmem:[%s1140_s4] sm:$0xff]   ;;  %v858_v60 = vld [vmem:[%s1142_s6 + $0x18] sm:$0xff]   ;;  %v859_v61 = vld [vmem:[%s1142_s6 + $0x10] sm:$0xff]  }
   0x8   :  { %188 = vmatprep.subr.bf16.mxu0 %v894_v0  ;;  %v90_v34 = vld [vmem:[%s1141_s3] sm:$0x7]  ;;  %v860_v62 = vld [vmem:[%s1142_s6 + $0x8] sm:$0xff]   ;;  %v863_v15 = vld [vmem:[%s1144_s8 + $0x10] sm:$0xff]  }
   0x9   :  { %839 = vset.pattern.permute.xlu1 %v897_v9  ;;  %v99_v38 = vrot.slane %v90_v34, %v98_v33  ;;  %v231_v40 = vrot.slane %v90_v34, %v230_v36  ;;  %v241_v41 = vrot.slane %v90_v34, %v240_v37  ;;  %v861_v63 = vld [vmem:[%s1142_s6] sm:$0xff]   ;;  %v866_v32 = vld [vmem:[%s1146_s10 + $0x18] sm:$0xff]   ;;  %v867_v33 = vld [vmem:[%s1146_s10 + $0x10] sm:$0xff]  }
   0xa   :  { %840 = vset.pattern.permute.xlu0 %v897_v9  ;;  %235 = vperm.xlu1 %839, %v89_v3   ;;  %v868_v34 = vld [vmem:[%s1146_s10 + $0x8] sm:$0xff]   ;;  %v728_v36 = vld [vmem:[%s1147_s9] ss:$0 sm:$0xff] }
   0xb   :  { %189 = vmatpush1.bf16.msra.mxu0 %v843_v8  ;;  %774 = vmatpush3.bf16.msra.mxu1 %v855_v29 }
   0xc   :  { %190 = vmatprep.subr.bf16.mxu0 %v894_v0  ;;  %775 = vmatprep.subr.bf16.mxu1 %v895_v5 }
   0xf   :  { %191 = vmatpush1.bf16.msra.mxu0 %v844_v10  ;;  %776 = vmatpush3.bf16.msra.mxu1 %v856_v30 }
  0x10   :  { %192 = vmatprep.subr.bf16.mxu0 %v894_v0  ;;  %777 = vmatprep.subr.bf16.mxu1 %v895_v5 }
  0x13   :  { %193 = vmatpush1.bf16.msra.mxu0 %v845_v11  ;;  %778 = vmatpush3.bf16.msra.mxu1 %v857_v31 }
  0x14   :  { %194 = vmatprep.subr.bf16.mxu0 %v894_v0  ;;  %783 = vmatprep.subr.bf16.mxu1 %v895_v5 }
  0x17   :  { %195 = vmatpush1.bf16.msra.mxu0 %v846_v12 }
  0x18   :  { %196 = vmatprep.subr.bf16.mxu0 %v894_v0 }
  0x1b   :  { %197 = vmatpush1.bf16.msra.mxu0 %v847_v13 }
  0x1c   :  { %198 = vmatprep.subr.bf16.mxu0 %v894_v0 }
  0x1f   :  { %199 = vmatpush1.bf16.msra.mxu0 %v848_v14  ;;  %v862_v14 = vld [vmem:[%s1144_s8 + $0x18] sm:$0xff]  }
  0x20   :  { %206 = vmatprep.subr.bf16.mxu0 %v894_v0 }
  0x23   :  { %207 = vmatpush2.bf16.msra.mxu0 %v182_v16  ;;  %v864_v16 = vld [vmem:[%s1144_s8 + $0x8] sm:$0xff]  }
  0x24   :  { %208 = vmatprep.subr.bf16.mxu0 %v894_v0 }
  0x27   :  { %209 = vmatpush2.bf16.msra.mxu0 %v850_v17  ;;  %v865_v17 = vld [vmem:[%s1144_s8] sm:$0xff]  }
  0x28   :  { %210 = vmatprep.subr.bf16.mxu0 %v894_v0 }
  0x2b   :  { %211 = vmatpush2.bf16.msra.mxu0 %v851_v18  ;;  %v722_v18 = vld [vmem:[%s1145_s7] ss:$0 sm:$0xff] }
  0x2c   :  { %212 = vmatprep.subr.bf16.mxu0 %v894_v0 }
  0x2f   :  { %213 = vmatpush2.bf16.msra.mxu0 %v852_v19 }
  0x30   :  { %214 = vmatprep.subr.bf16.mxu0 %v894_v0  ;;  %v716_v0 = vld [vmem:[%s1143_s5] ss:$0 sm:$0xff] }
  0x33   :  { %215 = vmatpush2.bf16.msra.mxu0 %v853_v20 }
  0x34   :  { %819 = vmatprep.subr.bf16.mxu0 %v895_v5 }
  0x7d   :  { %v54_v24 = vpop.permute.xlu0 %53 }
  0x7e   :  { %vm56_vm1 = vcmp.eq.s32.totalorder %v51_v23, %v54_v24  ;;  %vm55_vm2 = vcmp.eq.s32.totalorder %v50_v22, %v54_v24 }
  0x7f   :  { %v699_v25 = vsel %vm56_vm1, 1.0, %v895_v5  ;;  %vm714_vm4 = vmpackc.low %vm55_vm2, %vm55_vm2 }
  0x80   :  { %v62_v26 = vpack.c.bf16 %v699_v25, %v699_v25  ;;  %v226_v35 = vpop.permute.xlu1 %225 }
  0x81   :  { %v94_v39 = vpop.permute.xlu0 %93  ;;  %v232_v45 = vmul.f32 %v231_v40, %v226_v35  ;;  %v869_v35 = vld [vmem:[%s1146_s10] sm:$0xff]  }
  0x82   :  { %713 = vmatprep.mubr.msk.bf16.mxu0 %vm176_vm3, %v62_v26  ;;  %v100_v43 = vmul.f32 %v99_v38, %v94_v39 }
  0x83   :  { %715 = vmatmul.mubr.msk.bf16.vlgmr.msra.gmra.mxu0 %vm714_vm4, %v898_v27 }
  0x84   :  { %827 = vmatprep.mubr.msk.bf16.mxu0 %vm899_vm5, %v895_v5 }
  0x85   :  { %v236_v42 = vpop.permute.xlu1 %235 }
  0x86   :  { %v242_v47 = vmul.f32 %v241_v41, %v236_v42 }
 0x143   :  { %v218_v44 = vpop.f32.mrf.mxu0 }
 0x144   :  { %v219_v46 = vadd.f32 %v218_v44, %v100_v43 }
 0x145   :  { %v220_v48 = vpop.f32.mrf.mxu0 }
 0x146   :  { %v233_v49 = vadd.f32 %v232_v45, %v219_v46 }
 0x147   :  { %v221_v50 = vpop.f32.mrf.mxu0 }
 0x148   :  { %v243_v51 = vadd.f32 %v242_v47, %v233_v49  ;;  %v870_v49 = vld [vmem:[%s1148_s12 + $0x18] sm:$0xff]   ;;  %v871_v50 = vld [vmem:[%s1148_s12 + $0x10] sm:$0xff]  }
 0x149   :  { %v222_v52 = vpop.f32.mrf.mxu0  ;;  %820 = vmatpush3.bf16.msra.mxu0 %v870_v49 }
 0x14a   :  { %v244_v53 = vsub.f32 0.0, %v243_v51  ;;  %821 = vmatprep.subr.bf16.mxu0 %v895_v5  ;;  %v873_v52 = vld [vmem:[%s1148_s12] sm:$0xff]  }
 0x14c   :  { %v245_v54 = vmul.f32 1.442695, %v244_v53  ;;  %v734_v53 = vld [vmem:[%s1149_s11] ss:$0 sm:$0xff] }
 0x14d   :  { %822 = vmatpush3.bf16.msra.mxu0 %v871_v50 }
 0x14e   :  { %874 = vpow2.f32 %v245_v54  ;;  %823 = vmatprep.subr.bf16.mxu0 %v895_v5 }
 0x15b   :  { %v875_v55 = vpop.eup %874 }
 0x15c   :  { %v247_v56 = vadd.f32 1.0, %v875_v55 }
 0x15e   :  { %876 = vrcp.f32 %v247_v56 }
 0x16b   :  { %v877_v57 = vpop.eup %876 }
 0x16c   :  { %v249_v58 = vmul.f32 %v877_v57, %v243_v51  ;;  %v872_v51 = vld [vmem:[%s1148_s12 + $0x8] sm:$0xff]  }
 0x16d   :  { %824 = vmatpush3.bf16.msra.mxu0 %v872_v51 }
 0x16e   :  { %v250_v59 = vpack.c.bf16 %v249_v58, %v249_v58  ;;  %825 = vmatprep.subr.bf16.mxu0 %v895_v5 }
 0x170   :  { %780 = vmatmul.mubr.msk.bf16.vlgmr.msra.gmra.mxu1 %vm290_vm6, %v250_v59 }
 0x171   :  { %791 = vmatprep.mubr.msk.bf16.mxu1 %vm899_vm5, %v895_v5  ;;  %784 = vmatpush3.bf16.msra.mxu1 %v858_v60 }
 0x172   :  { %785 = vmatprep.subr.bf16.mxu1 %v895_v5  ;;  %826 = vmatpush3.bf16.msra.mxu0 %v873_v52 }
 0x175   :  { %786 = vmatpush3.bf16.msra.mxu1 %v859_v61 }
 0x176   :  { %787 = vmatprep.subr.bf16.mxu1 %v895_v5 }
 0x179   :  { %788 = vmatpush3.bf16.msra.mxu1 %v860_v62 }
 0x17a   :  { %789 = vmatprep.subr.bf16.mxu1 %v895_v5 }
 0x17d   :  { %790 = vmatpush3.bf16.msra.mxu1 %v861_v63 }
 0x17e   :  { %795 = vmatprep.subr.bf16.mxu1 %v895_v5 }
 0x230   :  { %v328_v1 = vpop.f32.mrf.mxu1 }
 0x231   :  { %v329_v2 = vadd.f32 %v716_v0, %v328_v1 }
 0x232   :  { %v781_v3 = vpop.f32.mrf.mxu1 }
 0x233   :  { %v334_v4 = vsub.f32 0.0, %v329_v2 }
 0x234   :  { %v331_v6 = vpop.f32.mrf.mxu1 }
 0x235   :  { %v335_v7 = vmul.f32 1.442695, %v334_v4 }
 0x236   :  { %v782_v8 = vpop.f32.mrf.mxu1 }
 0x237   :  { %878 = vpow2.f32 %v335_v7 }
 0x244   :  { %v879_v9 = vpop.eup %878 }
 0x245   :  { %v337_v10 = vadd.f32 1.0, %v879_v9 }
 0x247   :  { %880 = vrcp.f32 %v337_v10 }
 0x254   :  { %v881_v11 = vpop.eup %880 }
 0x255   :  { %v339_v12 = vmul.f32 %v881_v11, %v329_v2  ;;  %v740_v2 = vld [vmem:[%s1150_s13] ss:$0 sm:$0xff] }
 0x257   :  { %v340_v13 = vpack.c.bf16 %v339_v12, %v339_v12 }
 0x259   :  { %792 = vmatmul.mubr.msk.bf16.vlgmr.msra.gmra.mxu1 %vm290_vm6, %v340_v13 }
 0x25a   :  { %803 = vmatprep.mubr.msk.bf16.mxu1 %vm899_vm5, %v895_v5  ;;  %796 = vmatpush3.bf16.msra.mxu1 %v862_v14 }
 0x25b   :  { %797 = vmatprep.subr.bf16.mxu1 %v895_v5 }
 0x25e   :  { %798 = vmatpush3.bf16.msra.mxu1 %v863_v15 }
 0x25f   :  { %799 = vmatprep.subr.bf16.mxu1 %v895_v5 }
 0x262   :  { %800 = vmatpush3.bf16.msra.mxu1 %v864_v16 }
 0x263   :  { %801 = vmatprep.subr.bf16.mxu1 %v895_v5 }
 0x266   :  { %802 = vmatpush3.bf16.msra.mxu1 %v865_v17 }
 0x267   :  { %807 = vmatprep.subr.bf16.mxu1 %v895_v5 }
 0x319   :  { %v417_v19 = vpop.f32.mrf.mxu1 }
 0x31a   :  { %v418_v20 = vadd.f32 %v722_v18, %v417_v19 }
 0x31b   :  { %v793_v21 = vpop.f32.mrf.mxu1 }
 0x31c   :  { %v423_v22 = vadd.f32 %v418_v20, %v249_v58 }
 0x31d   :  { %v420_v23 = vpop.f32.mrf.mxu1 }
 0x31e   :  { %v424_v24 = vsub.f32 0.0, %v423_v22 }
 0x31f   :  { %v794_v25 = vpop.f32.mrf.mxu1 }
 0x320   :  { %v425_v26 = vmul.f32 1.442695, %v424_v24 }
 0x322   :  { %882 = vpow2.f32 %v425_v26 }
 0x32f   :  { %v883_v27 = vpop.eup %882 }
 0x330   :  { %v427_v28 = vadd.f32 1.0, %v883_v27 }
 0x332   :  { %884 = vrcp.f32 %v427_v28 }
 0x33f   :  { %v885_v29 = vpop.eup %884 }
 0x340   :  { %v429_v30 = vmul.f32 %v885_v29, %v423_v22 }
 0x342   :  { %v430_v31 = vpack.c.bf16 %v429_v30, %v429_v30 }
 0x344   :  { %804 = vmatmul.mubr.msk.bf16.vlgmr.msra.gmra.mxu1 %vm290_vm6, %v430_v31 }
 0x345   :  { %815 = vmatprep.mubr.msk.bf16.mxu1 %vm899_vm5, %v895_v5  ;;  %808 = vmatpush3.bf16.msra.mxu1 %v866_v32 }
 0x346   :  { %809 = vmatprep.subr.bf16.mxu1 %v895_v5 }
 0x349   :  { %810 = vmatpush3.bf16.msra.mxu1 %v867_v33 }
 0x34a   :  { %811 = vmatprep.subr.bf16.mxu1 %v895_v5 }
 0x34d   :  { %812 = vmatpush3.bf16.msra.mxu1 %v868_v34 }
 0x34e   :  { %813 = vmatprep.subr.bf16.mxu1 %v895_v5 }
 0x351   :  { %814 = vmatpush3.bf16.msra.mxu1 %v869_v35 }
 0x404   :  { %v507_v37 = vpop.f32.mrf.mxu1 }
 0x405   :  { %v508_v38 = vadd.f32 %v728_v36, %v507_v37 }
 0x406   :  { %v805_v39 = vpop.f32.mrf.mxu1 }
 0x407   :  { %v513_v40 = vsub.f32 0.0, %v508_v38 }
 0x408   :  { %v510_v41 = vpop.f32.mrf.mxu1 }
 0x409   :  { %v514_v42 = vmul.f32 1.442695, %v513_v40 }
 0x40a   :  { %v806_v43 = vpop.f32.mrf.mxu1 }
 0x40b   :  { %886 = vpow2.f32 %v514_v42 }
 0x418   :  { %v887_v44 = vpop.eup %886 }
 0x419   :  { %v516_v45 = vadd.f32 1.0, %v887_v44 }
 0x41b   :  { %888 = vrcp.f32 %v516_v45 }
 0x428   :  { %v889_v46 = vpop.eup %888 }
 0x429   :  { %v518_v47 = vmul.f32 %v889_v46, %v508_v38 }
 0x42b   :  { %v519_v48 = vpack.c.bf16 %v518_v47, %v518_v47 }
 0x42d   :  { %816 = vmatmul.mubr.msk.bf16.vlgmr.msra.gmra.mxu1 %vm290_vm6, %v519_v48 }
 0x4ed   :  { %v596_v54 = vpop.f32.mrf.mxu1 }
 0x4ee   :  { %v597_v55 = vadd.f32 %v734_v53, %v596_v54 }
 0x4ef   :  { %v817_v56 = vpop.f32.mrf.mxu1 }
 0x4f0   :  { %v602_v57 = vadd.f32 %v597_v55, %v429_v30 }
 0x4f1   :  { %v599_v58 = vpop.f32.mrf.mxu1 }
 0x4f2   :  { %v603_v59 = vsub.f32 0.0, %v602_v57 }
 0x4f3   :  { %v818_v60 = vpop.f32.mrf.mxu1 }
 0x4f4   :  { %v604_v61 = vmul.f32 1.442695, %v603_v59 }
 0x4f6   :  { %890 = vpow2.f32 %v604_v61 }
 0x503   :  { %v891_v62 = vpop.eup %890 }
 0x504   :  { %v606_v5 = vadd.f32 1.0, %v891_v62 }
 0x506   :  { %892 = vrcp.f32 %v606_v5 }
 0x513   :  { %v893_v63 = vpop.eup %892 }
 0x514   :  { %v608_v0 = vmul.f32 %v893_v63, %v602_v57 }
 0x516   :  { %v609_v1 = vpack.c.bf16 %v608_v0, %v608_v0 }
 0x518   :  { %828 = vmatmul.mubr.msk.bf16.vlgmr.msra.gmra.mxu0 %vm290_vm6, %v609_v1 }
 0x5d8   :  { %v686_v3 = vpop.f32.mrf.mxu0 }
 0x5d9   :  { %v687_v4 = vadd.f32 %v740_v2, %v686_v3 }
 0x5da   :  { %v829_v6 = vpop.f32.mrf.mxu0 }
 0x5db   :  { %693 = vst.msk [vmem:[%s1151_s14] sm:$0xff] %vm692_vm7, %v687_v4 }
 0x5dc   :  { %v689_v7 = vpop.f32.mrf.mxu0 }
 0x5de   :  { %v830_v8 = vpop.f32.mrf.mxu0 }

</bundles_post_ra>
